<compile_context>
chip_gen: v6e
topology: v6e:2x2x1
jax: 0.10.0
libtpu: 0.0.40
codegen_flags: <defaults>
</compile_context>

<pallas_src>
import functools

import jax
import jax.numpy as jnp
import numpy as np
from jax.experimental import pallas as pl
from jax.experimental.pallas import tpu as pltpu


# ----------------------------------------------------------------------------
# Pure-JAX reference (for validation only)
# ----------------------------------------------------------------------------
def amp_to_impulse_response_jax(amp, target_size):
    """Mirror of NoiseFilter.amp_to_impulse_response (torch) in JAX."""
    amp_c = amp.astype(jnp.complex64)               # imaginary part == 0
    amp = jnp.fft.irfft(amp_c, axis=-1)             # length 2*(n_bands-1)
    filter_size = amp.shape[-1]
    amp = jnp.roll(amp, filter_size // 2, axis=-1)
    n = jnp.arange(filter_size, dtype=amp.dtype)
    # torch.hann_window default is periodic=True: 0.5*(1 - cos(2*pi*n/N))
    win = 0.5 - 0.5 * jnp.cos(2.0 * jnp.pi * n / filter_size)
    amp = amp * win
    pad = [(0, 0)] * (amp.ndim - 1) + [(0, int(target_size) - int(filter_size))]
    amp = jnp.pad(amp, pad)
    amp = jnp.roll(amp, -(filter_size // 2), axis=-1)
    return amp


def fft_convolve_ref(signal, kernel):
    signal = jnp.pad(signal, [(0, 0)] * (signal.ndim - 1) + [(0, signal.shape[-1])])
    kernel = jnp.pad(kernel, [(0, 0)] * (kernel.ndim - 1) + [(kernel.shape[-1], 0)])
    output = jnp.fft.irfft(jnp.fft.rfft(signal) * jnp.fft.rfft(kernel))
    return output[..., output.shape[-1] // 2:]


def noise_filter_ref(filter_bank, noise, hop_length):
    """Pure-JAX reference for the whole forward pass (given the noise)."""
    impulse = amp_to_impulse_response_jax(filter_bank, hop_length)
    out = fft_convolve_ref(noise, impulse)
    return out.reshape(out.shape[0], -1, 1)


# ----------------------------------------------------------------------------
# Constant-matrix construction (numpy, float64 -> bf16)
# ----------------------------------------------------------------------------
def _impulse_matrix_np(n_bands, hop):
    """Linear operator W (n_bands, hop): amp -> impulse response."""
    eye = np.eye(n_bands, dtype=np.float64)
    amp = np.fft.irfft(eye, axis=-1)                      # (n_bands, 2*(nb-1))
    filter_size = amp.shape[-1]
    amp = np.roll(amp, filter_size // 2, axis=-1)
    n = np.arange(filter_size, dtype=np.float64)
    win = 0.5 - 0.5 * np.cos(2.0 * np.pi * n / filter_size)   # periodic hann
    amp = amp * win
    amp = np.pad(amp, [(0, 0), (0, hop - filter_size)])
    amp = np.roll(amp, -(filter_size // 2), axis=-1)
    return amp                                            # (n_bands, hop)


def _dft_constants(n_bands, hop, dtype):
    """Nyquist-packed DFT constants: CNS (hop,2*hop), WCS (n_bands,2*hop),
    IC (hop,hop), IS (hop,hop).

    Packing: frequency lane k=0 carries (DC in the "re" half, Nyquist in the
    "im" half); lanes 1..hop-1 are ordinary rfft bins.  Both DC and Nyquist
    of a real signal are purely real, so nothing is lost.
    """
    L = 2 * hop
    w = 2.0 * np.pi / L

    n = np.arange(hop, dtype=np.float64)[:, None]
    k = np.arange(hop, dtype=np.float64)[None, :]

    # Forward DFT of the right-padded noise (nonzero samples at t = n).
    CN = np.cos(w * n * k)
    SN = -np.sin(w * n * k)
    SN[:, 0] = np.cos(np.pi * n[:, 0])                   # Nyquist -> im lane 0

    # Forward DFT of the left-padded impulse (nonzero samples at t = n + hop).
    CK = np.cos(w * (n + hop) * k)
    SK = -np.sin(w * (n + hop) * k)
    SK[:, 0] = np.cos(np.pi * (n[:, 0] + hop))           # Nyquist -> im lane 0

    W = _impulse_matrix_np(n_bands, hop)                 # fold amp->impulse
    WC = W @ CK
    WS = W @ SK

    # Hermitian-weighted inverse DFT restricted to samples [hop, 2*hop).
    kk = np.arange(hop, dtype=np.float64)[:, None]
    p = np.arange(hop, dtype=np.float64)[None, :]
    wk = np.where(kk == 0, 1.0, 2.0)                     # DC weight 1, rest 2
    IC = wk * np.cos(w * kk * (hop + p)) / L             # row 0 == 1/L (DC)
    IS = -wk * np.sin(w * kk * (hop + p)) / L
    IS[0, :] = np.cos(np.pi * (hop + p[0, :])) / L       # packed Nyquist row

    CNS = np.concatenate([CN, SN], axis=1)               # (hop,     2*hop)
    WCS = np.concatenate([WC, WS], axis=1)               # (n_bands, 2*hop)

    return (jnp.asarray(CNS, dtype), jnp.asarray(WCS, dtype),
            jnp.asarray(IC, dtype), jnp.asarray(IS, dtype))


# ----------------------------------------------------------------------------
# Pallas kernel
# ----------------------------------------------------------------------------
def _noise_filter_kernel(amp_ref, noise_ref, cns_ref, wcs_ref, ic_ref, is_ref,
                         out_ref, *, hop):
    bf16 = jnp.bfloat16
    dot = functools.partial(jnp.dot, preferred_element_type=jnp.float32)

    # Forward DFTs (Hermitian half, Nyquist packed into the DC imaginary lane).
    # Inputs arrive as f32 refs and are cast to bf16 here (no wrapper pass).
    s = dot(noise_ref[...].astype(bf16), cns_ref[...])    # (tile, 2*hop) f32
    h = dot(amp_ref[...].astype(bf16), wcs_ref[...])      # (tile, 2*hop) f32

    s_re, s_im = s[:, :hop], s[:, hop:]
    h_re, h_im = h[:, :hop], h[:, hop:]

    rr = s_re * h_re
    ii = s_im * h_im
    ri = s_re * h_im
    ir = s_im * h_re

    # Lane 0 carries (DC, Nyquist), both purely real: the product there is
    # elementwise (no cross terms); every other lane is a complex multiply.
    lane0 = jax.lax.broadcasted_iota(jnp.int32, rr.shape, 1) == 0
    p_re = jnp.where(lane0, rr, rr - ii)
    p_im = jnp.where(lane0, ii, ri + ir)

    # Weighted inverse DFT keeping only the last `hop` samples; two half-dots
    # on separate constant refs instead of an in-kernel concatenate.
    out = dot(p_re.astype(bf16), ic_ref[...]) + dot(p_im.astype(bf16), is_ref[...])
    out_ref[...] = out.astype(out_ref.dtype)


def noise_filter_pallas(filter_bank, noise, hop_length=256, tile_rows=512,
                        out_dtype=jnp.float32):
    """Pallas implementation of NoiseFilter.forward (noise passed explicitly).

    tile_rows: rows of B*T processed per grid step (multiple of 8, capped at
    B*T).  256-1024 is good on all generations (v5e included: only the
    128-lane N/K alignment matters, which hop=256 satisfies); larger tiles
    amortise the ~0.35 us per-step overhead.
    out_dtype: jnp.float32 (default) or jnp.bfloat16 to cut output HBM traffic.
    """
    B, T, n_bands = filter_bank.shape
    hop = int(hop_length)
    assert noise.shape == (B, T, hop)
    bf16 = jnp.bfloat16

    CNS, WCS, IC, IS = _dft_constants(n_bands, hop, bf16)

    R = B * T
    r8 = -(-R // 8) * 8                               # rows rounded to sublanes
    tile = max(8, min((int(tile_rows) // 8) * 8, r8))
    steps = pl.cdiv(R, tile)

    # Dual-TensorCore v7x only: prefer an even number of >=256-row steps so the
    # "parallel" grid axis splits evenly across both cores.  Single-TC v5e/v6e
    # just take the largest tile.
    dev_kind = (getattr(jax.devices()[0], "device_kind", "") or "").lower()
    if "v7" in dev_kind and R >= 512 and steps % 2 == 1:
        cand = -(-pl.cdiv(R, steps + 1) // 8) * 8
        if cand >= 256 and pl.cdiv(R, cand) % 2 == 0:
            tile = cand
            steps = pl.cdiv(R, cand)

    # Flatten only (free reshape); no cast, no pad -- partial edge blocks are
    # masked by Pallas and garbage rows never leak across row-independent math.
    amp2 = filter_bank.reshape(R, n_bands)
    noise2 = noise.reshape(R, hop)

    row_spec = lambda cols: pl.BlockSpec((tile, cols), lambda i: (i, 0))
    const_spec = lambda shape: pl.BlockSpec(shape, lambda i: (0, 0))

    kernel = functools.partial(_noise_filter_kernel, hop=hop)

    # VMEM budget at tile=1024, hop=256: constants ~0.5 MiB bf16 (x2 buffers),
    # f32 I/O tiles ~6 MiB double-buffered, f32 intermediates ~6 MiB -> well
    # under the 32 MiB scoped limit on every generation (incl. v7x's 64 MiB).
    out2 = pl.pallas_call(
        kernel,
        out_shape=jax.ShapeDtypeStruct((R, hop), out_dtype),
        grid_spec=pltpu.PrefetchScalarGridSpec(
            num_scalar_prefetch=0,
            grid=(steps,),
            in_specs=[
                row_spec(n_bands),               # amp   (f32, cast in kernel)
                row_spec(hop),                   # noise (f32, cast in kernel)
                const_spec((hop, 2 * hop)),      # [CN | SN]      (bf16)
                const_spec((n_bands, 2 * hop)),  # W @ [CK | SK]  (bf16)
                const_spec((hop, hop)),          # IC (weighted inverse, re)
                const_spec((hop, hop)),          # IS (weighted inverse, im)
            ],
            out_specs=row_spec(hop),
        ),
        compiler_params=pltpu.CompilerParams(
            dimension_semantics=("parallel",),
            vmem_limit_bytes=32 * 1024 * 1024,
        ),
    )(amp2, noise2, CNS, WCS, IC, IS)

    return out2.reshape(B, T * hop, 1)


# ----------------------------------------------------------------------------
# Demo / correctness check
# ----------------------------------------------------------------------------
if __name__ == "__main__":
    key = jax.random.PRNGKey(0)
    k_amp, k_noise = jax.random.split(key)

    B, T, n_bands = 2, 8, 16          # frames x filter-bank bands
    hop = 256                         # module default hop_length

    filter_bank = jax.random.uniform(k_amp, (B, T, n_bands), dtype=jnp.float32)
    # TODO(synk): torch.rand's RNG stream is not reproducible in JAX; the
    # uniform[-1, 1) noise is generated here with jax.random and passed in.
    noise = jax.random.uniform(k_noise, (B, T, hop), dtype=jnp.float32) * 2.0 - 1.0

    out = noise_filter_pallas(filter_bank, noise, hop_length=hop)
    out = jax.block_until_ready(out)

    assert out.shape == (B, T * hop, 1), out.shape

    ref = noise_filter_ref(filter_bank, noise, hop)
    scale = float(jnp.max(jnp.abs(ref)))
    max_err = float(jnp.max(jnp.abs(out - ref)))
    # bf16 operands / f32 accumulation over 512 frequency bins: a few e-3
    # typical, ~1e-2 worst case here; 5e-2 relative keeps healthy margin.
    assert max_err <= 5e-2 * max(scale, 1.0), (max_err, scale)

    print("KERNEL_OK")
</pallas_src>

<mosaic_0001>
module attributes {stable_mosaic.version = 11 : i64} {
  func.func @_noise_filter_kernel(%arg0: i32, %arg1: memref<16x16xf32, #tpu.memory_space<vmem>>, %arg2: memref<16x256xf32, #tpu.memory_space<vmem>>, %arg3: memref<256x512xbf16, #tpu.memory_space<vmem>>, %arg4: memref<16x512xbf16, #tpu.memory_space<vmem>>, %arg5: memref<256x256xbf16, #tpu.memory_space<vmem>>, %arg6: memref<256x256xbf16, #tpu.memory_space<vmem>>, %arg7: memref<16x256xf32, #tpu.memory_space<vmem>>) attributes {dimension_semantics = [#tpu.dimension_semantics<parallel>], iteration_bounds = array<i64: 1>, scalar_prefetch = 0 : i64, scratch_operands = 0 : i64, tpu.core_type = #tpu.core_type<tc>, window_params = [{transform_indices = @transform_0, window_bounds = array<i64: 16, 16>}, {transform_indices = @transform_1, window_bounds = array<i64: 16, 256>}, {pipeline_mode = #tpu.pipeline_mode<synchronous>, transform_indices = @transform_2, window_bounds = array<i64: 256, 512>}, {pipeline_mode = #tpu.pipeline_mode<synchronous>, transform_indices = @transform_3, window_bounds = array<i64: 16, 512>}, {pipeline_mode = #tpu.pipeline_mode<synchronous>, transform_indices = @transform_4, window_bounds = array<i64: 256, 256>}, {pipeline_mode = #tpu.pipeline_mode<synchronous>, transform_indices = @transform_5, window_bounds = array<i64: 256, 256>}, {transform_indices = @transform_6, window_bounds = array<i64: 16, 256>}]} {
    %c0 = arith.constant 0 : index
    %c0_0 = arith.constant 0 : index
    %0 = vector.load %arg2[%c0, %c0_0] : memref<16x256xf32, #tpu.memory_space<vmem>>, vector<16x256xf32>
    %1 = arith.truncf %0 : vector<16x256xf32> to vector<16x256xbf16>
    %c0_1 = arith.constant 0 : index
    %c0_2 = arith.constant 0 : index
    %2 = vector.load %arg3[%c0_1, %c0_2] : memref<256x512xbf16, #tpu.memory_space<vmem>>, vector<256x512xbf16>
    %cst = arith.constant dense<0.000000e+00> : vector<16x512xf32>
    %3 = tpu.matmul %1, %2, %cst {dimension_numbers = #tpu.dot_dimension_numbers<[1], [0], [0], [1], [0, 0, 1, 1], [], []>} : vector<16x256xbf16>, vector<256x512xbf16>, vector<16x512xf32> -> vector<16x512xf32>
    %c0_3 = arith.constant 0 : index
    %c0_4 = arith.constant 0 : index
    %4 = vector.load %arg1[%c0_3, %c0_4] : memref<16x16xf32, #tpu.memory_space<vmem>>, vector<16x16xf32>
    %5 = arith.truncf %4 : vector<16x16xf32> to vector<16x16xbf16>
    %c0_5 = arith.constant 0 : index
    %c0_6 = arith.constant 0 : index
    %6 = vector.load %arg4[%c0_5, %c0_6] : memref<16x512xbf16, #tpu.memory_space<vmem>>, vector<16x512xbf16>
    %cst_7 = arith.constant dense<0.000000e+00> : vector<16x512xf32>
    %7 = tpu.matmul %5, %6, %cst_7 {dimension_numbers = #tpu.dot_dimension_numbers<[1], [0], [0], [1], [0, 0, 1, 1], [], []>} : vector<16x16xbf16>, vector<16x512xbf16>, vector<16x512xf32> -> vector<16x512xf32>
    %8 = vector.extract_strided_slice %3 {offsets = [0, 0], sizes = [16, 256], strides = [1, 1]} : vector<16x512xf32> to vector<16x256xf32>
    %9 = vector.extract_strided_slice %3 {offsets = [0, 256], sizes = [16, 256], strides = [1, 1]} : vector<16x512xf32> to vector<16x256xf32>
    %10 = vector.extract_strided_slice %7 {offsets = [0, 0], sizes = [16, 256], strides = [1, 1]} : vector<16x512xf32> to vector<16x256xf32>
    %11 = vector.extract_strided_slice %7 {offsets = [0, 256], sizes = [16, 256], strides = [1, 1]} : vector<16x512xf32> to vector<16x256xf32>
    %12 = arith.mulf %8, %10 : vector<16x256xf32>
    %13 = arith.mulf %9, %11 : vector<16x256xf32>
    %14 = arith.mulf %8, %11 : vector<16x256xf32>
    %15 = arith.mulf %9, %10 : vector<16x256xf32>
    %16 = tpu.iota {dimensions = array<i32: 1>} : vector<16x256xi32>
    %c0_i32 = arith.constant 0 : i32
    %17 = vector.broadcast %c0_i32 : i32 to vector<16x256xi32>
    %18 = arith.cmpi eq, %16, %17 : vector<16x256xi32>
    %19 = arith.subf %12, %13 : vector<16x256xf32>
    %20 = arith.select %18, %12, %19 : vector<16x256xi1>, vector<16x256xf32>
    %21 = arith.addf %14, %15 : vector<16x256xf32>
    %22 = arith.select %18, %13, %21 : vector<16x256xi1>, vector<16x256xf32>
    %23 = arith.truncf %20 : vector<16x256xf32> to vector<16x256xbf16>
    %c0_8 = arith.constant 0 : index
    %c0_9 = arith.constant 0 : index
    %24 = vector.load %arg5[%c0_8, %c0_9] : memref<256x256xbf16, #tpu.memory_space<vmem>>, vector<256x256xbf16>
    %cst_10 = arith.constant dense<0.000000e+00> : vector<16x256xf32>
    %25 = tpu.matmul %23, %24, %cst_10 {dimension_numbers = #tpu.dot_dimension_numbers<[1], [0], [0], [1], [0, 0, 1, 1], [], []>} : vector<16x256xbf16>, vector<256x256xbf16>, vector<16x256xf32> -> vector<16x256xf32>
    %26 = arith.truncf %22 : vector<16x256xf32> to vector<16x256xbf16>
    %c0_11 = arith.constant 0 : index
    %c0_12 = arith.constant 0 : index
    %27 = vector.load %arg6[%c0_11, %c0_12] : memref<256x256xbf16, #tpu.memory_space<vmem>>, vector<256x256xbf16>
    %cst_13 = arith.constant dense<0.000000e+00> : vector<16x256xf32>
    %28 = tpu.matmul %26, %27, %cst_13 {dimension_numbers = #tpu.dot_dimension_numbers<[1], [0], [0], [1], [0, 0, 1, 1], [], []>} : vector<16x256xbf16>, vector<256x256xbf16>, vector<16x256xf32> -> vector<16x256xf32>
    %29 = arith.addf %25, %28 : vector<16x256xf32>
    %c0_14 = arith.constant 0 : index
    %c0_15 = arith.constant 0 : index
    %30 = vector.load %arg7[%c0_14, %c0_15] : memref<16x256xf32, #tpu.memory_space<vmem>>, vector<16x256xf32>
    tpu.vector_store %arg7[%c0_14, %c0_15], %29 {strides = array<i32>} : memref<16x256xf32, #tpu.memory_space<vmem>>, vector<16x256xf32>,
    return
  }
  func.func @transform_0(%arg0: i32) -> (i32, i32) {
    %c0_i32 = arith.constant 0 : i32
    %c0_i32_0 = arith.constant 0 : i32
    return %arg0, %c0_i32 : i32, i32
  }
  func.func @transform_1(%arg0: i32) -> (i32, i32) {
    %c0_i32 = arith.constant 0 : i32
    %c0_i32_0 = arith.constant 0 : i32
    return %arg0, %c0_i32 : i32, i32
  }
  func.func @transform_2(%arg0: i32) -> (i32, i32) {
    %c0_i32 = arith.constant 0 : i32
    %c0_i32_0 = arith.constant 0 : i32
    %c0_i32_1 = arith.constant 0 : i32
    return %c0_i32, %c0_i32_0 : i32, i32
  }
  func.func @transform_3(%arg0: i32) -> (i32, i32) {
    %c0_i32 = arith.constant 0 : i32
    %c0_i32_0 = arith.constant 0 : i32
    %c0_i32_1 = arith.constant 0 : i32
    return %c0_i32, %c0_i32_0 : i32, i32
  }
  func.func @transform_4(%arg0: i32) -> (i32, i32) {
    %c0_i32 = arith.constant 0 : i32
    %c0_i32_0 = arith.constant 0 : i32
    %c0_i32_1 = arith.constant 0 : i32
    return %c0_i32, %c0_i32_0 : i32, i32
  }
  func.func @transform_5(%arg0: i32) -> (i32, i32) {
    %c0_i32 = arith.constant 0 : i32
    %c0_i32_0 = arith.constant 0 : i32
    %c0_i32_1 = arith.constant 0 : i32
    return %c0_i32, %c0_i32_0 : i32, i32
  }
  func.func @transform_6(%arg0: i32) -> (i32, i32) {
    %c0_i32 = arith.constant 0 : i32
    %c0_i32_0 = arith.constant 0 : i32
    return %arg0, %c0_i32 : i32, i32
  }
}

</mosaic_0001>

<bundles_post_ra>
// kernel: tpu_custom_call.1
= control target key start
LH: loop header
LB: loop body
LE: loop exit
PB: predicated region body
PF: predicated region fallthrough
CT: control target
= control target key end

     0   :  { %11 = vsyncpa [#allocation3], 0  ;;  %s1818_s0 = inlined_call_operand.hbm [shape: f32[16,16], index: 0, kind: input, shape index: {}]   ;;  %s1819_s1 = inlined_call_operand.hbm [shape: f32[16,256], index: 1, kind: input, shape index: {}]   ;;  %s1820_s2 = inlined_call_operand.hbm [shape: bf16[256,512], index: 2, kind: input, shape index: {}]   ;;  %s1821_s3 = inlined_call_operand.hbm [shape: bf16[16,512], index: 3, kind: input, shape index: {}]   ;;  %s1822_s4 = inlined_call_operand.hbm [shape: bf16[256,256], index: 4, kind: input, shape index: {}]   ;;  %s1823_s5 = inlined_call_operand.hbm [shape: bf16[256,256], index: 5, kind: input, shape index: {}]   ;;  %s1824_s6 = inlined_call_operand.hbm [shape: f32[16,256], index: 6, kind: output, shape index: {}]  }
   0x1   :  { %12 = vsyncpa [#allocation6], 0 }
   0x2   :  { %13 = vsyncpa [#allocation9], 0 }
   0x3   :  { %14 = vsyncpa [#allocation12], 0 }
   0x4   :  { %15 = vsyncpa [#allocation4], 0  ;;  %s1729_s21 = smov [#allocation5]  }
   0x5   :  { %s33_s22 = sshll.u32 %s1729_s21, 4  ;;  %s34_s22 = int_to_ptr.vmem [resolvable:$true] %s33_s22 }
   0x6   :  { %s1587_s23 = scalar_lea.vmem %s34_s22, 512  ;;  %p1592_p1 = scmp.lt.s32.totalorder %s34_s22, %s34_s22 }
   0x7   :  { %p1588_p0 = scmp.ne.s32.totalorder %s34_s22, %s1587_s23  ;;  %p1593_p2 = scmp.lt.s32.totalorder %s1587_s23, %s1587_s23 }
   0x9   :  { %p1594_p3 = por %p1593_p2, %p1592_p1 }
   0xb   :  { %p1595_p4 = pnand %p1594_p3, %p1588_p0 }
   0xd   :  { %1598 = shalt.err (!%p1595_p4)
}
   0xe   :  { %s1730_s24 = smov 256   ;;  %s1731_s25 = smov 16  }
   0xf   :  { %39 = dma.hbm_to_vmem [thread:$0]  %s1819_s1, 512, %s34_s22, [#allocation6], %s1730_s24, %s1730_s24, %s1731_s25  }
  0x10   :  { %s1732_s28 = smov [#allocation8]   ;;  %s1733_s30 = smov [#allocation2]  }
  0x11   :  { %s57_s29 = sshll.u32 %s1732_s28, 4  ;;  %s21_s7 = sshll.u32 %s1733_s30, 4  ;;  %s58_s29 = int_to_ptr.vmem [resolvable:$true] %s57_s29  ;;  %s22_s7 = int_to_ptr.vmem [resolvable:$true] %s21_s7 }
  0x12   :  { %s1607_s8 = scalar_lea.vmem %s58_s29, 512  ;;  %p1612_p6 = scmp.lt.s32.totalorder %s58_s29, %s58_s29 }
  0x13   :  { %p1608_p5 = scmp.ne.s32.totalorder %s58_s29, %s1607_s8  ;;  %p1613_p7 = scmp.lt.s32.totalorder %s1607_s8, %s1607_s8 }
  0x15   :  { %p1614_p8 = por %p1613_p7, %p1612_p6 }
  0x17   :  { %p1615_p9 = pnand %p1614_p8, %p1608_p5 }
  0x19   :  { %1618 = shalt.err (!%p1615_p9)
}
  0x1a   :  { %63 = dma.hbm_to_vmem [thread:$0]  %s1821_s3, 512, %s58_s29, [#allocation9], %s1730_s24, %s1730_s24, %s1731_s25  }
  0x1b   :  { %s1627_s1 = scalar_lea.vmem %s22_s7, 256  ;;  %p1632_p11 = scmp.lt.s32.totalorder %s22_s7, %s22_s7 }
  0x1c   :  { %p1628_p10 = scmp.ne.s32.totalorder %s22_s7, %s1627_s1  ;;  %p1633_p12 = scmp.lt.s32.totalorder %s1627_s1, %s1627_s1 }
  0x1e   :  { %p1634_p13 = por %p1633_p12, %p1632_p11 }
  0x20   :  { %p1635_p0 = pnand %p1634_p13, %p1628_p10 }
  0x22   :  { %1638 = shalt.err (!%p1635_p0)
}
  0x23   :  { %s1734_s11 = smov 128   ;;  %s1735_s12 = smov 8  }
  0x24   :  { %27 = dma.hbm_to_vmem [thread:$0]  %s1818_s0, 256, %s22_s7, [#allocation3], %s1734_s11, %s1734_s11, %s1735_s12  }
  0x25   :  { %s1736_s15 = smov [#allocation7]   ;;  %s1737_s3 = smov [#allocation10]  }
  0x26   :  { %s45_s16 = sshll.u32 %s1736_s15, 4  ;;  %s69_s17 = sshll.u32 %s1737_s3, 4  ;;  %s46_s16 = int_to_ptr.vmem [resolvable:$true] %s45_s16  ;;  %s70_s17 = int_to_ptr.vmem [resolvable:$true] %s69_s17 }
  0x27   :  { %s1647_s18 = scalar_lea.vmem %s46_s16, 8192  ;;  %p1652_p2 = scmp.lt.s32.totalorder %s46_s16, %s46_s16 }
  0x28   :  { %p1648_p1 = scmp.ne.s32.totalorder %s46_s16, %s1647_s18  ;;  %p1653_p3 = scmp.lt.s32.totalorder %s1647_s18, %s1647_s18 }
  0x2a   :  { %p1654_p4 = por %p1653_p3, %p1652_p2 }
  0x2c   :  { %p1655_p5 = pnand %p1654_p4, %p1648_p1 }
  0x2e   :  { %1658 = shalt.err (!%p1655_p5)
}
  0x2f   :  { %51 = dma.hbm_to_vmem [thread:$0]  %s1820_s2, 8192, %s46_s16, [#allocation6], %s1730_s24, %s1730_s24, %s1731_s25  }
  0x30   :  { %s1667_s0 = scalar_lea.vmem %s70_s17, 4096  ;;  %p1672_p7 = scmp.lt.s32.totalorder %s70_s17, %s70_s17 }
  0x31   :  { %p1668_p6 = scmp.ne.s32.totalorder %s70_s17, %s1667_s0  ;;  %p1673_p8 = scmp.lt.s32.totalorder %s1667_s0, %s1667_s0 }
  0x33   :  { %p1674_p9 = por %p1673_p8, %p1672_p7 }
  0x35   :  { %p1675_p10 = pnand %p1674_p9, %p1668_p6 }
  0x37   :  { %1678 = shalt.err (!%p1675_p10)
}
  0x38   :  { %75 = dma.hbm_to_vmem [thread:$0]  %s1822_s4, 4096, %s70_s17, [#allocation9], %s1734_s11, %s1734_s11, %s1735_s12  }
  0x39   :  { %s1738_s23 = smov [#allocation11]  }
  0x3a   :  { %s81_s26 = sshll.u32 %s1738_s23, 4  ;;  %s82_s26 = int_to_ptr.vmem [resolvable:$true] %s81_s26 }
  0x3b   :  { %s1687_s27 = scalar_lea.vmem %s82_s26, 4096  ;;  %p1692_p12 = scmp.lt.s32.totalorder %s82_s26, %s82_s26 }
  0x3c   :  { %p1688_p11 = scmp.ne.s32.totalorder %s82_s26, %s1687_s27  ;;  %p1693_p13 = scmp.lt.s32.totalorder %s1687_s27, %s1687_s27 }
  0x3e   :  { %p1694_p0 = por %p1693_p13, %p1692_p12 }
  0x40   :  { %p1695_p1 = pnand %p1694_p0, %p1688_p11 }
  0x42   :  { %1698 = shalt.err (!%p1695_p1)
}
  0x43   :  { %87 = dma.hbm_to_vmem [thread:$0]  %s1823_s5, 4096, %s82_s26, [#allocation12], %s1734_s11, %s1734_s11, %s1735_s12  }
  0x44   :  { %1719 = dma.done.wait [#allocation3], 256  }
  0x45   :  { %1720 = vsyncadd [#allocation3], 4294967040 }
  0x46   :  { %1721 = dma.done.wait [#allocation6], 8704  }
  0x47   :  { %1722 = vsyncadd [#allocation6], 4294958592 }
  0x48   :  { %1723 = dma.done.wait [#allocation9], 4608  }
  0x49   :  { %1724 = vsyncadd [#allocation9], 4294962688 }
  0x4a   :  { %1725 = dma.done.wait [#allocation12], 4096  }
  0x4b   :  { %1726 = vsyncadd [#allocation12], 4294963200  ;;  %v1381_v0 = vld [vmem:[#allocation7 + $0xe4] ss:$16 sps:$4 sm:$0xff]   ;;  %v1383_v1 = vld [vmem:[#allocation7 + $0xec] ss:$16 sps:$4 sm:$0xff]  }
  0x4c   :  { %497 = vmatprep.subr.bf16.mxu0 %v1381_v0  ;;  %v1385_v2 = vld [vmem:[#allocation7 + $0xe0] ss:$16 sps:$4 sm:$0xff]   ;;  %v1386_v3 = vld [vmem:[#allocation7 + $0xe8] ss:$16 sps:$4 sm:$0xff]   ;;  %540 = vmatprep.subr.bf16.mxu1 %v1383_v1  ;;  %v1387_v4 = vld [vmem:[#allocation7 + $0xc4] ss:$16 sps:$4 sm:$0xff]  }
  0x4d   :  { %498 = vmatpush1.bf16.msra.mxu0 %v1385_v2  ;;  %541 = vmatpush1.bf16.msra.mxu1 %v1386_v3  ;;  %v1389_v5 = vld [vmem:[#allocation7 + $0xcc] ss:$16 sps:$4 sm:$0xff]   ;;  %v1391_v6 = vld [vmem:[#allocation7 + $0xc0] ss:$16 sps:$4 sm:$0xff]   ;;  %v1392_v7 = vld [vmem:[#allocation7 + $0xc8] ss:$16 sps:$4 sm:$0xff]  }
  0x4e   :  { %499 = vmatprep.subr.bf16.mxu0 %v1387_v4  ;;  %542 = vmatprep.subr.bf16.mxu1 %v1389_v5  ;;  %v1393_v8 = vld [vmem:[#allocation7 + $0xa4] ss:$16 sps:$4 sm:$0xff]   ;;  %v1395_v9 = vld [vmem:[#allocation7 + $0xac] ss:$16 sps:$4 sm:$0xff]   ;;  %v1397_v10 = vld [vmem:[#allocation7 + $0xa0] ss:$16 sps:$4 sm:$0xff]  }
  0x4f   :  { %v1398_v11 = vld [vmem:[#allocation7 + $0xa8] ss:$16 sps:$4 sm:$0xff]   ;;  %v1399_v12 = vld [vmem:[#allocation7 + $0x84] ss:$16 sps:$4 sm:$0xff]   ;;  %v1401_v13 = vld [vmem:[#allocation7 + $0x8c] ss:$16 sps:$4 sm:$0xff]  }
  0x50   :  { %v1403_v14 = vld [vmem:[#allocation7 + $0x80] ss:$16 sps:$4 sm:$0xff]   ;;  %v1404_v15 = vld [vmem:[#allocation7 + $0x88] ss:$16 sps:$4 sm:$0xff]   ;;  %v1405_v16 = vld [vmem:[#allocation7 + $0x64] ss:$16 sps:$4 sm:$0xff]  }
  0x51   :  { %500 = vmatpush1.bf16.msra.mxu0 %v1391_v6  ;;  %543 = vmatpush1.bf16.msra.mxu1 %v1392_v7  ;;  %v1407_v17 = vld [vmem:[#allocation7 + $0x6c] ss:$16 sps:$4 sm:$0xff]   ;;  %v1409_v18 = vld [vmem:[#allocation7 + $0x60] ss:$16 sps:$4 sm:$0xff]   ;;  %v1410_v19 = vld [vmem:[#allocation7 + $0x68] ss:$16 sps:$4 sm:$0xff]  }
  0x52   :  { %501 = vmatprep.subr.bf16.mxu0 %v1393_v8  ;;  %544 = vmatprep.subr.bf16.mxu1 %v1395_v9  ;;  %v1411_v20 = vld [vmem:[#allocation7 + $0x44] ss:$16 sps:$4 sm:$0xff]   ;;  %v1413_v21 = vld [vmem:[#allocation7 + $0x4c] ss:$16 sps:$4 sm:$0xff]   ;;  %v1415_v22 = vld [vmem:[#allocation7 + $0x40] ss:$16 sps:$4 sm:$0xff]  }
  0x53   :  { %v1416_v23 = vld [vmem:[#allocation7 + $0x48] ss:$16 sps:$4 sm:$0xff]   ;;  %v1417_v24 = vld [vmem:[#allocation7 + $0x24] ss:$16 sps:$4 sm:$0xff]   ;;  %v1419_v25 = vld [vmem:[#allocation7 + $0x2c] ss:$16 sps:$4 sm:$0xff]  }
  0x54   :  { %v1421_v26 = vld [vmem:[#allocation7 + $0x20] ss:$16 sps:$4 sm:$0xff]   ;;  %v1422_v27 = vld [vmem:[#allocation7 + $0x28] ss:$16 sps:$4 sm:$0xff]   ;;  %v1423_v28 = vld [vmem:[#allocation7 + $0x4] ss:$16 sps:$4 sm:$0xff]  }
  0x55   :  { %502 = vmatpush1.bf16.msra.mxu0 %v1397_v10  ;;  %545 = vmatpush1.bf16.msra.mxu1 %v1398_v11  ;;  %v1425_v29 = vld [vmem:[#allocation7 + $0xc] ss:$16 sps:$4 sm:$0xff]   ;;  %v1427_v30 = vld [vmem:[#allocation7] ss:$16 sps:$4 sm:$0xff]   ;;  %v1428_v31 = vld [vmem:[#allocation7 + $0x8] ss:$16 sps:$4 sm:$0xff]  }
  0x56   :  { %503 = vmatprep.subr.bf16.mxu0 %v1399_v12  ;;  %546 = vmatprep.subr.bf16.mxu1 %v1401_v13  ;;  %v1429_v32 = vld [vmem:[#allocation7 + $0x1e4] ss:$16 sps:$4 sm:$0xff]   ;;  %v1431_v33 = vld [vmem:[#allocation7 + $0x1ec] ss:$16 sps:$4 sm:$0xff]   ;;  %v1433_v34 = vld [vmem:[#allocation7 + $0x1e0] ss:$16 sps:$4 sm:$0xff]  }
  0x57   :  { %v1434_v35 = vld [vmem:[#allocation7 + $0x1e8] ss:$16 sps:$4 sm:$0xff]   ;;  %v1435_v36 = vld [vmem:[#allocation7 + $0x1c4] ss:$16 sps:$4 sm:$0xff]   ;;  %v1437_v37 = vld [vmem:[#allocation7 + $0x1cc] ss:$16 sps:$4 sm:$0xff]  }
  0x58   :  { %v1439_v38 = vld [vmem:[#allocation7 + $0x1c0] ss:$16 sps:$4 sm:$0xff]   ;;  %v1440_v39 = vld [vmem:[#allocation7 + $0x1c8] ss:$16 sps:$4 sm:$0xff]   ;;  %v1441_v40 = vld [vmem:[#allocation7 + $0x1a4] ss:$16 sps:$4 sm:$0xff]  }
  0x59   :  { %504 = vmatpush1.bf16.msra.mxu0 %v1403_v14  ;;  %547 = vmatpush1.bf16.msra.mxu1 %v1404_v15  ;;  %v1443_v41 = vld [vmem:[#allocation7 + $0x1ac] ss:$16 sps:$4 sm:$0xff]   ;;  %v1445_v42 = vld [vmem:[#allocation7 + $0x1a0] ss:$16 sps:$4 sm:$0xff]   ;;  %v1446_v43 = vld [vmem:[#allocation7 + $0x1a8] ss:$16 sps:$4 sm:$0xff]  }
  0x5a   :  { %505 = vmatprep.subr.bf16.mxu0 %v1405_v16  ;;  %548 = vmatprep.subr.bf16.mxu1 %v1407_v17  ;;  %v1447_v44 = vld [vmem:[#allocation7 + $0x184] ss:$16 sps:$4 sm:$0xff]   ;;  %v1449_v45 = vld [vmem:[#allocation7 + $0x18c] ss:$16 sps:$4 sm:$0xff]   ;;  %v1451_v47 = vld [vmem:[#allocation7 + $0x180] ss:$16 sps:$4 sm:$0xff]  }
  0x5b   :  { %v108_v46 = vld [vmem:[#allocation5 + $0x8] sm:$0xff]  ;;  %v110_v49 = vld [vmem:[#allocation5 + $0x18] sm:$0xff]  ;;  %v1453_v50 = vld [vmem:[#allocation7 + $0x164] ss:$16 sps:$4 sm:$0xff]   ;;  %v1739_v14 = vmov 0   ;;  %vm610_vm0 = vcmask 130048  }
  0x5c   :  { %v1452_v48 = vld [vmem:[#allocation7 + $0x188] ss:$16 sps:$4 sm:$0xff]   ;;  %v112_v51 = vpack.c.bf16 %v110_v49, %v108_v46  ;;  %v1455_v52 = vld [vmem:[#allocation7 + $0x16c] ss:$16 sps:$4 sm:$0xff]   ;;  %v1457_v53 = vld [vmem:[#allocation7 + $0x160] ss:$16 sps:$4 sm:$0xff]  }
  0x5d   :  { %506 = vmatpush1.bf16.msra.mxu0 %v1409_v18  ;;  %549 = vmatpush1.bf16.msra.mxu1 %v1410_v19  ;;  %v1458_v54 = vld [vmem:[#allocation7 + $0x168] ss:$16 sps:$4 sm:$0xff]   ;;  %v1459_v55 = vld [vmem:[#allocation7 + $0x144] ss:$16 sps:$4 sm:$0xff]   ;;  %v1461_v56 = vld [vmem:[#allocation7 + $0x14c] ss:$16 sps:$4 sm:$0xff]  }
  0x5e   :  { %507 = vmatprep.subr.bf16.mxu0 %v1411_v20  ;;  %550 = vmatprep.subr.bf16.mxu1 %v1413_v21  ;;  %v1463_v57 = vld [vmem:[#allocation7 + $0x140] ss:$16 sps:$4 sm:$0xff]   ;;  %v1464_v58 = vld [vmem:[#allocation7 + $0x148] ss:$16 sps:$4 sm:$0xff]   ;;  %v1465_v59 = vld [vmem:[#allocation7 + $0x124] ss:$16 sps:$4 sm:$0xff]  }
  0x5f   :  { %529 = vmatprep.mubr.bf16.mxu0 %v112_v51  ;;  %572 = vmatprep.mubr.bf16.mxu1 %v112_v51  ;;  %v1467_v60 = vld [vmem:[#allocation7 + $0x12c] ss:$16 sps:$4 sm:$0xff]   ;;  %v1469_v61 = vld [vmem:[#allocation7 + $0x120] ss:$16 sps:$4 sm:$0xff]   ;;  %v1470_v62 = vld [vmem:[#allocation7 + $0x128] ss:$16 sps:$4 sm:$0xff]  }
  0x60   :  { %v1471_v63 = vld [vmem:[#allocation7 + $0x104] ss:$16 sps:$4 sm:$0xff]   ;;  %v1473_v0 = vld [vmem:[#allocation7 + $0x10c] ss:$16 sps:$4 sm:$0xff]   ;;  %v1475_v1 = vld [vmem:[#allocation7 + $0x100] ss:$16 sps:$4 sm:$0xff]  }
  0x61   :  { %508 = vmatpush1.bf16.msra.mxu0 %v1415_v22  ;;  %551 = vmatpush1.bf16.msra.mxu1 %v1416_v23  ;;  %v1476_v2 = vld [vmem:[#allocation7 + $0x108] ss:$16 sps:$4 sm:$0xff]   ;;  %v107_v3 = vld [vmem:[#allocation5] sm:$0xff]  ;;  %v109_v4 = vld [vmem:[#allocation5 + $0x10] sm:$0xff]  ;;  %s1740_s4 = smov [#allocation13]  }
  0x62   :  { %509 = vmatprep.subr.bf16.mxu0 %v1417_v24  ;;  %552 = vmatprep.subr.bf16.mxu1 %v1419_v25  ;;  %v1479_v5 = vld [vmem:[#allocation8 + $0x4] ss:$16 sps:$4 sm:$0xff]   ;;  %v1482_v6 = vld [vmem:[#allocation8 + $0xc] ss:$16 sps:$4 sm:$0xff]   ;;  %v111_v7 = vpack.c.bf16 %v109_v4, %v107_v3  ;;  %v1477_v8 = vld [vmem:[#allocation8] ss:$16 sps:$4 sm:$0xff]  }
  0x63   :  { %v1480_v9 = vld [vmem:[#allocation8 + $0x8] ss:$16 sps:$4 sm:$0xff]   ;;  %v1485_v10 = vld [vmem:[#allocation11 + $0x74] ss:$8 sps:$4 sm:$0xff]   ;;  %v1491_v18 = vld [vmem:[#allocation11 + $0x64] ss:$8 sps:$4 sm:$0xff]  }
  0x64   :  { %v1488_v11 = vld [vmem:[#allocation10 + $0x74] ss:$8 sps:$4 sm:$0xff]   ;;  %v1483_v16 = vld [vmem:[#allocation11 + $0x70] ss:$8 sps:$4 sm:$0xff]   ;;  %v1494_v19 = vld [vmem:[#allocation10 + $0x64] ss:$8 sps:$4 sm:$0xff]  }
  0x65   :  { %510 = vmatpush1.bf16.msra.mxu0 %v1421_v26  ;;  %553 = vmatpush1.bf16.msra.mxu1 %v1422_v27  ;;  %v583_v12 = vld [vmem:[#allocation2] sm:$0xff]  ;;  %v584_v13 = vld [vmem:[#allocation2 + $0x8] sm:$0xff]  ;;  %v1489_v20 = vld [vmem:[#allocation11 + $0x60] ss:$8 sps:$4 sm:$0xff]   ;;  %s1220_s5 = sshll.u32 %s1740_s4, 4  ;;  %s1221_s5 = int_to_ptr.vmem [resolvable:$true] %s1220_s5 }
  0x66   :  { %511 = vmatprep.subr.bf16.mxu0 %v1423_v28  ;;  %554 = vmatprep.subr.bf16.mxu1 %v1425_v29  ;;  %v585_v15 = vpack.c.bf16 %v584_v13, %v583_v12  ;;  %v1486_v17 = vld [vmem:[#allocation10 + $0x70] ss:$8 sps:$4 sm:$0xff]   ;;  %v1492_v21 = vld [vmem:[#allocation10 + $0x60] ss:$8 sps:$4 sm:$0xff]   ;;  %v1497_v22 = vld [vmem:[#allocation11 + $0x54] ss:$8 sps:$4 sm:$0xff]   ;;  %p1704_p3 = scmp.lt.s32.totalorder %s1221_s5, %s1221_s5 }
  0x67   :  { %v1500_v23 = vld [vmem:[#allocation10 + $0x54] ss:$8 sps:$4 sm:$0xff]   ;;  %v1495_v24 = vld [vmem:[#allocation11 + $0x50] ss:$8 sps:$4 sm:$0xff]   ;;  %v1503_v26 = vld [vmem:[#allocation11 + $0x44] ss:$8 sps:$4 sm:$0xff]  }
  0x68   :  { %v1498_v25 = vld [vmem:[#allocation10 + $0x50] ss:$8 sps:$4 sm:$0xff]   ;;  %v1506_v27 = vld [vmem:[#allocation10 + $0x44] ss:$8 sps:$4 sm:$0xff]   ;;  %v1501_v28 = vld [vmem:[#allocation11 + $0x40] ss:$8 sps:$4 sm:$0xff]  }
  0x69   :  { %512 = vmatpush1.bf16.msra.mxu0 %v1427_v30  ;;  %555 = vmatpush1.bf16.msra.mxu1 %v1428_v31  ;;  %v1504_v29 = vld [vmem:[#allocation10 + $0x40] ss:$8 sps:$4 sm:$0xff]   ;;  %v1509_v30 = vld [vmem:[#allocation11 + $0x34] ss:$8 sps:$4 sm:$0xff]   ;;  %v1534_v49 = vld [vmem:[#allocation10 + $0xf0] ss:$8 sps:$4 sm:$0xff]  }
  0x6a   :  { %513 = vmatprep.subr.bf16.mxu0 %v1429_v32  ;;  %556 = vmatprep.subr.bf16.mxu1 %v1431_v33  ;;  %v1512_v31 = vld [vmem:[#allocation10 + $0x34] ss:$8 sps:$4 sm:$0xff]   ;;  %v1507_v32 = vld [vmem:[#allocation11 + $0x30] ss:$8 sps:$4 sm:$0xff]   ;;  %v1542_v51 = vld [vmem:[#allocation10 + $0xe4] ss:$8 sps:$4 sm:$0xff]  }
  0x6b   :  { %v1510_v33 = vld [vmem:[#allocation10 + $0x30] ss:$8 sps:$4 sm:$0xff]   ;;  %v1533_v46 = vld [vmem:[#allocation11 + $0xf4] ss:$8 sps:$4 sm:$0xff]   ;;  %v1566_v3 = vld [vmem:[#allocation10 + $0xa4] ss:$8 sps:$4 sm:$0xff]  }
  0x6c   :  { %v1561_v4 = vld [vmem:[#allocation11 + $0xa0] ss:$8 sps:$4 sm:$0xff]   ;;  %s1699_s29 = scalar_lea.vmem %s1221_s5, 512 }
  0x6d   :  { %514 = vmatpush2.bf16.msra.mxu0 %v1433_v34  ;;  %557 = vmatpush2.bf16.msra.mxu1 %v1434_v35  ;;  %v1515_v34 = vld [vmem:[#allocation11 + $0x24] ss:$8 sps:$4 sm:$0xff]   ;;  %v1573_v12 = vld [vmem:[#allocation11 + $0x80] ss:$8 sps:$4 sm:$0xff]   ;;  %p1700_p2 = scmp.ne.s32.totalorder %s1221_s5, %s1699_s29  ;;  %p1705_p4 = scmp.lt.s32.totalorder %s1699_s29, %s1699_s29 }
  0x6e   :  { %515 = vmatprep.subr.bf16.mxu0 %v1435_v36  ;;  %558 = vmatprep.subr.bf16.mxu1 %v1437_v37  ;;  %v1518_v35 = vld [vmem:[#allocation10 + $0x24] ss:$8 sps:$4 sm:$0xff]   ;;  %v1513_v36 = vld [vmem:[#allocation11 + $0x20] ss:$8 sps:$4 sm:$0xff]  }
  0x6f   :  { %v1516_v37 = vld [vmem:[#allocation10 + $0x20] ss:$8 sps:$4 sm:$0xff]   ;;  %p1706_p5 = por %p1705_p4, %p1704_p3 }
  0x70   :  { %v1576_v13 = vld [vmem:[#allocation10 + $0x80] ss:$8 sps:$4 sm:$0xff]  }
  0x71   :  { %516 = vmatpush2.bf16.msra.mxu0 %v1439_v38  ;;  %559 = vmatpush2.bf16.msra.mxu1 %v1440_v39  ;;  %v1521_v38 = vld [vmem:[#allocation11 + $0x14] ss:$8 sps:$4 sm:$0xff]   ;;  %p1707_p6 = pnand %p1706_p5, %p1700_p2 }
  0x72   :  { %517 = vmatprep.subr.bf16.mxu0 %v1441_v40  ;;  %560 = vmatprep.subr.bf16.mxu1 %v1443_v41  ;;  %v1524_v39 = vld [vmem:[#allocation10 + $0x14] ss:$8 sps:$4 sm:$0xff]   ;;  %v1519_v40 = vld [vmem:[#allocation11 + $0x10] ss:$8 sps:$4 sm:$0xff]  }
  0x73   :  { %v1522_v41 = vld [vmem:[#allocation10 + $0x10] ss:$8 sps:$4 sm:$0xff]  }
  0x75   :  { %518 = vmatpush2.bf16.msra.mxu0 %v1445_v42  ;;  %561 = vmatpush2.bf16.msra.mxu1 %v1446_v43  ;;  %v1527_v42 = vld [vmem:[#allocation11 + $0x4] ss:$8 sps:$4 sm:$0xff]  }
  0x76   :  { %519 = vmatprep.subr.bf16.mxu0 %v1447_v44  ;;  %562 = vmatprep.subr.bf16.mxu1 %v1449_v45  ;;  %v1530_v43 = vld [vmem:[#allocation10 + $0x4] ss:$8 sps:$4 sm:$0xff]   ;;  %v1525_v44 = vld [vmem:[#allocation11] ss:$8 sps:$4 sm:$0xff]  }
  0x77   :  { %v1528_v45 = vld [vmem:[#allocation10] ss:$8 sps:$4 sm:$0xff]  }
  0x79   :  { %520 = vmatpush2.bf16.msra.mxu0 %v1451_v47  ;;  %563 = vmatpush2.bf16.msra.mxu1 %v1452_v48  ;;  %v1536_v47 = vld [vmem:[#allocation10 + $0xf4] ss:$8 sps:$4 sm:$0xff]   ;;  %v1531_v48 = vld [vmem:[#allocation11 + $0xf0] ss:$8 sps:$4 sm:$0xff]  }
  0x7a   :  { %521 = vmatprep.subr.bf16.mxu0 %v1453_v50  ;;  %564 = vmatprep.subr.bf16.mxu1 %v1455_v52  ;;  %v1539_v50 = vld [vmem:[#allocation11 + $0xe4] ss:$8 sps:$4 sm:$0xff]   ;;  %v1537_v52 = vld [vmem:[#allocation11 + $0xe0] ss:$8 sps:$4 sm:$0xff]  }
  0x7d   :  { %522 = vmatpush2.bf16.msra.mxu0 %v1457_v53  ;;  %565 = vmatpush2.bf16.msra.mxu1 %v1458_v54  ;;  %v1540_v53 = vld [vmem:[#allocation10 + $0xe0] ss:$8 sps:$4 sm:$0xff]   ;;  %v1545_v54 = vld [vmem:[#allocation11 + $0xd4] ss:$8 sps:$4 sm:$0xff]  }
  0x7e   :  { %523 = vmatprep.subr.bf16.mxu0 %v1459_v55  ;;  %566 = vmatprep.subr.bf16.mxu1 %v1461_v56  ;;  %v1548_v55 = vld [vmem:[#allocation10 + $0xd4] ss:$8 sps:$4 sm:$0xff]   ;;  %v1543_v56 = vld [vmem:[#allocation11 + $0xd0] ss:$8 sps:$4 sm:$0xff]  }
  0x81   :  { %524 = vmatpush2.bf16.msra.mxu0 %v1463_v57  ;;  %567 = vmatpush2.bf16.msra.mxu1 %v1464_v58  ;;  %v1546_v57 = vld [vmem:[#allocation10 + $0xd0] ss:$8 sps:$4 sm:$0xff]   ;;  %v1551_v58 = vld [vmem:[#allocation11 + $0xc4] ss:$8 sps:$4 sm:$0xff]  }
  0x82   :  { %525 = vmatprep.subr.bf16.mxu0 %v1465_v59  ;;  %568 = vmatprep.subr.bf16.mxu1 %v1467_v60  ;;  %v1554_v59 = vld [vmem:[#allocation10 + $0xc4] ss:$8 sps:$4 sm:$0xff]   ;;  %v1549_v60 = vld [vmem:[#allocation11 + $0xc0] ss:$8 sps:$4 sm:$0xff]  }
  0x85   :  { %526 = vmatpush2.bf16.msra.mxu0 %v1469_v61  ;;  %569 = vmatpush2.bf16.msra.mxu1 %v1470_v62  ;;  %v1552_v61 = vld [vmem:[#allocation10 + $0xc0] ss:$8 sps:$4 sm:$0xff]   ;;  %v1557_v62 = vld [vmem:[#allocation11 + $0xb4] ss:$8 sps:$4 sm:$0xff]  }
  0x86   :  { %527 = vmatprep.subr.bf16.mxu0 %v1471_v63  ;;  %570 = vmatprep.subr.bf16.mxu1 %v1473_v0  ;;  %v1560_v63 = vld [vmem:[#allocation10 + $0xb4] ss:$8 sps:$4 sm:$0xff]   ;;  %v1555_v0 = vld [vmem:[#allocation11 + $0xb0] ss:$8 sps:$4 sm:$0xff]  }
  0x89   :  { %528 = vmatpush2.bf16.msra.mxu0 %v1475_v1  ;;  %571 = vmatpush2.bf16.msra.mxu1 %v1476_v2  ;;  %v1558_v1 = vld [vmem:[#allocation10 + $0xb0] ss:$8 sps:$4 sm:$0xff]   ;;  %v1563_v2 = vld [vmem:[#allocation11 + $0xa4] ss:$8 sps:$4 sm:$0xff]  }
  0x8a   :  { %628 = vmatprep.subr.bf16.mxu0 %v1479_v5  ;;  %671 = vmatprep.subr.bf16.mxu1 %v1482_v6  ;;  %v1564_v5 = vld [vmem:[#allocation10 + $0xa0] ss:$8 sps:$4 sm:$0xff]   ;;  %v1569_v6 = vld [vmem:[#allocation11 + $0x94] ss:$8 sps:$4 sm:$0xff]  }
  0x8c   :  { %530 = vmatmul.mubr.bf16.vlgmr.msra.gmra.mxu0 %v111_v7  ;;  %573 = vmatmul.mubr.bf16.vlgmr.msra.gmra.mxu1 %v111_v7  ;;  %v1572_v7 = vld [vmem:[#allocation10 + $0x94] ss:$8 sps:$4 sm:$0xff]  }
  0x8d   :  { %629 = vmatpush1.bf16.msra.mxu0 %v1477_v8  ;;  %672 = vmatpush1.bf16.msra.mxu1 %v1480_v9  ;;  %v1567_v8 = vld [vmem:[#allocation11 + $0x90] ss:$8 sps:$4 sm:$0xff]  }
  0x8e   :  { %646 = vmatprep.mubr.bf16.mxu0 %v1739_v14  ;;  %689 = vmatprep.mubr.bf16.mxu1 %v1739_v14  ;;  %v1570_v9 = vld [vmem:[#allocation10 + $0x90] ss:$8 sps:$4 sm:$0xff]  }
  0x8f   :  { %965 = vmatprep.subr.bf16.mxu0 %v1485_v10  ;;  %1168 = vmatprep.subr.bf16.mxu1 %v1488_v11  ;;  %v1575_v10 = vld [vmem:[#allocation11 + $0x84] ss:$8 sps:$4 sm:$0xff]  }
  0x90   :  { %v1578_v11 = vld [vmem:[#allocation10 + $0x84] ss:$8 sps:$4 sm:$0xff]  }
  0x94   :  { %1303 = vmatmul.mubr.msk.bf16.vlgmr.msra.gmra.mxu0 %vm610_vm0, %v585_v15  ;;  %1304 = vmatmul.mubr.msk.bf16.vlgmr.msra.gmra.mxu1 %vm610_vm0, %v585_v15 }
  0x95   :  { %966 = vmatpush1.bf16.msra.mxu0 %v1483_v16  ;;  %1169 = vmatpush1.bf16.msra.mxu1 %v1486_v17 }
  0x96   :  { %967 = vmatprep.subr.bf16.mxu0 %v1491_v18  ;;  %1170 = vmatprep.subr.bf16.mxu1 %v1494_v19 }
  0x99   :  { %968 = vmatpush1.bf16.msra.mxu0 %v1489_v20  ;;  %1171 = vmatpush1.bf16.msra.mxu1 %v1492_v21 }
  0x9a   :  { %969 = vmatprep.subr.bf16.mxu0 %v1497_v22  ;;  %1172 = vmatprep.subr.bf16.mxu1 %v1500_v23 }
  0x9d   :  { %970 = vmatpush1.bf16.msra.mxu0 %v1495_v24  ;;  %1173 = vmatpush1.bf16.msra.mxu1 %v1498_v25  ;;  %v716_v24 = vlaneseq }
  0x9e   :  { %971 = vmatprep.subr.bf16.mxu0 %v1503_v26  ;;  %1174 = vmatprep.subr.bf16.mxu1 %v1506_v27 }
  0xa1   :  { %972 = vmatpush1.bf16.msra.mxu0 %v1501_v28  ;;  %1175 = vmatpush1.bf16.msra.mxu1 %v1504_v29 }
  0xa2   :  { %973 = vmatprep.subr.bf16.mxu0 %v1509_v30  ;;  %1176 = vmatprep.subr.bf16.mxu1 %v1512_v31  ;;  %v717_v31 = vand.u32 127, %v716_v24 }
  0xa4   :  { %vm719_vm1 = vcmp.eq.s32.totalorder %v717_v31, 0 }
  0xa5   :  { %974 = vmatpush1.bf16.msra.mxu0 %v1507_v32  ;;  %1177 = vmatpush1.bf16.msra.mxu1 %v1510_v33 }
  0xa6   :  { %975 = vmatprep.subr.bf16.mxu0 %v1515_v34  ;;  %1178 = vmatprep.subr.bf16.mxu1 %v1518_v35 }
  0xa9   :  { %976 = vmatpush1.bf16.msra.mxu0 %v1513_v36  ;;  %1179 = vmatpush1.bf16.msra.mxu1 %v1516_v37 }
  0xaa   :  { %977 = vmatprep.subr.bf16.mxu0 %v1521_v38  ;;  %1180 = vmatprep.subr.bf16.mxu1 %v1524_v39 }
  0xad   :  { %978 = vmatpush1.bf16.msra.mxu0 %v1519_v40  ;;  %1181 = vmatpush1.bf16.msra.mxu1 %v1522_v41 }
  0xae   :  { %979 = vmatprep.subr.bf16.mxu0 %v1527_v42  ;;  %1182 = vmatprep.subr.bf16.mxu1 %v1530_v43 }
  0xb1   :  { %980 = vmatpush1.bf16.msra.mxu0 %v1525_v44  ;;  %1183 = vmatpush1.bf16.msra.mxu1 %v1528_v45 }
  0xb2   :  { %981 = vmatprep.subr.bf16.mxu0 %v1533_v46  ;;  %1184 = vmatprep.subr.bf16.mxu1 %v1536_v47 }
  0xb5   :  { %982 = vmatpush2.bf16.msra.mxu0 %v1531_v48  ;;  %1185 = vmatpush2.bf16.msra.mxu1 %v1534_v49 }
  0xb6   :  { %983 = vmatprep.subr.bf16.mxu0 %v1539_v50  ;;  %1186 = vmatprep.subr.bf16.mxu1 %v1542_v51 }
  0xb9   :  { %984 = vmatpush2.bf16.msra.mxu0 %v1537_v52  ;;  %1187 = vmatpush2.bf16.msra.mxu1 %v1540_v53 }
  0xba   :  { %985 = vmatprep.subr.bf16.mxu0 %v1545_v54  ;;  %1188 = vmatprep.subr.bf16.mxu1 %v1548_v55 }
  0xbd   :  { %986 = vmatpush2.bf16.msra.mxu0 %v1543_v56  ;;  %1189 = vmatpush2.bf16.msra.mxu1 %v1546_v57 }
  0xbe   :  { %987 = vmatprep.subr.bf16.mxu0 %v1551_v58  ;;  %1190 = vmatprep.subr.bf16.mxu1 %v1554_v59 }
  0xc1   :  { %988 = vmatpush2.bf16.msra.mxu0 %v1549_v60  ;;  %1191 = vmatpush2.bf16.msra.mxu1 %v1552_v61 }
  0xc2   :  { %989 = vmatprep.subr.bf16.mxu0 %v1557_v62  ;;  %1192 = vmatprep.subr.bf16.mxu1 %v1560_v63 }
  0xc5   :  { %990 = vmatpush2.bf16.msra.mxu0 %v1555_v0  ;;  %1193 = vmatpush2.bf16.msra.mxu1 %v1558_v1 }
  0xc6   :  { %991 = vmatprep.subr.bf16.mxu0 %v1563_v2  ;;  %1194 = vmatprep.subr.bf16.mxu1 %v1566_v3 }
  0xc9   :  { %992 = vmatpush2.bf16.msra.mxu0 %v1561_v4  ;;  %1195 = vmatpush2.bf16.msra.mxu1 %v1564_v5 }
  0xca   :  { %993 = vmatprep.subr.bf16.mxu0 %v1569_v6  ;;  %1196 = vmatprep.subr.bf16.mxu1 %v1572_v7 }
  0xcd   :  { %994 = vmatpush2.bf16.msra.mxu0 %v1567_v8  ;;  %1197 = vmatpush2.bf16.msra.mxu1 %v1570_v9 }
  0xce   :  { %995 = vmatprep.subr.bf16.mxu0 %v1575_v10  ;;  %1198 = vmatprep.subr.bf16.mxu1 %v1578_v11 }
  0xd1   :  { %996 = vmatpush2.bf16.msra.mxu0 %v1573_v12  ;;  %1199 = vmatpush2.bf16.msra.mxu1 %v1576_v13 }
 0x14c   :  { %v531_v14 = vpop.f32.mrf.mxu0  ;;  %v574_v15 = vpop.f32.mrf.mxu1 }
 0x14e   :  { %v533_v16 = vpop.f32.mrf.mxu0  ;;  %v576_v17 = vpop.f32.mrf.mxu1 }
 0x150   :  { %v535_v18 = vpop.f32.mrf.mxu0  ;;  %v578_v19 = vpop.f32.mrf.mxu1 }
 0x152   :  { %v537_v20 = vpop.f32.mrf.mxu0  ;;  %v580_v21 = vpop.f32.mrf.mxu1 }
 0x154   :  { %v648_v22 = vpop.f32.mrf.mxu0  ;;  %v691_v23 = vpop.f32.mrf.mxu1 }
 0x155   :  { %v700_v25 = vmul.f32 %v648_v22, %v531_v14  ;;  %v712_v26 = vmul.f32 %v648_v22, %v574_v15  ;;  %v704_v27 = vmul.f32 %v691_v23, %v574_v15  ;;  %v708_v28 = vmul.f32 %v691_v23, %v531_v14 }
 0x156   :  { %v650_v29 = vpop.f32.mrf.mxu0  ;;  %v693_v30 = vpop.f32.mrf.mxu1 }
 0x157   :  { %v701_v32 = vmul.f32 %v650_v29, %v533_v16  ;;  %v713_v33 = vmul.f32 %v650_v29, %v576_v17  ;;  %v705_v36 = vmul.f32 %v693_v30, %v576_v17  ;;  %v709_v37 = vmul.f32 %v693_v30, %v533_v16 }
 0x158   :  { %v652_v34 = vpop.f32.mrf.mxu0  ;;  %v695_v35 = vpop.f32.mrf.mxu1  ;;  %v721_v40 = vsub.f32 %v700_v25, %v704_v27  ;;  %v729_v41 = vadd.f32 %v712_v26, %v708_v28 }
 0x159   :  { %v702_v38 = vmul.f32 %v652_v34, %v535_v18  ;;  %v714_v39 = vmul.f32 %v652_v34, %v578_v19  ;;  %v706_v42 = vmul.f32 %v695_v35, %v578_v19  ;;  %v710_v43 = vmul.f32 %v695_v35, %v535_v18 }
 0x15a   :  { %v654_v44 = vpop.f32.mrf.mxu0  ;;  %v697_v45 = vpop.f32.mrf.mxu1  ;;  %v722_v52 = vsub.f32 %v701_v32, %v705_v36  ;;  %v730_v53 = vadd.f32 %v713_v33, %v709_v37  ;;  %v725_v58 = vsel %vm719_vm1, %v700_v25, %v721_v40  ;;  %v733_v59 = vsel %vm719_vm1, %v704_v27, %v729_v41 }
 0x15b   :  { %v703_v46 = vmul.f32 %v654_v44, %v537_v20  ;;  %v715_v47 = vmul.f32 %v654_v44, %v580_v21  ;;  %v707_v48 = vmul.f32 %v697_v45, %v580_v21  ;;  %v711_v49 = vmul.f32 %v697_v45, %v537_v20 }
 0x15c   :  { %v723_v50 = vsub.f32 %v702_v38, %v706_v42  ;;  %v731_v51 = vadd.f32 %v714_v39, %v710_v43 }
 0x15d   :  { %v724_v54 = vsub.f32 %v703_v46, %v707_v48  ;;  %v732_v55 = vadd.f32 %v715_v47, %v711_v49 }
 0x15e   :  { %v727_v56 = vsel %vm719_vm1, %v702_v38, %v723_v50  ;;  %v735_v57 = vsel %vm719_vm1, %v706_v42, %v731_v51 }
 0x15f   :  { %v772_v60 = vpack.c.bf16 %v732_v55, %v730_v53  ;;  %v738_v61 = vpack.c.bf16 %v724_v54, %v722_v52  ;;  %v771_v62 = vpack.c.bf16 %v735_v57, %v733_v59  ;;  %v737_v63 = vpack.c.bf16 %v727_v56, %v725_v58 }
 0x161   :  { %997 = vmatprep.mubr.bf16.mxu0 %v772_v60  ;;  %1200 = vmatprep.mubr.bf16.mxu1 %v738_v61 }
 0x162   :  { %998 = vmatmul.mubr.bf16.vlgmr.msra.gmra.mxu0 %v771_v62  ;;  %1201 = vmatmul.mubr.bf16.vlgmr.msra.gmra.mxu1 %v737_v63 }
 0x222   :  { %v999_v0 = vpop.f32.mrf.mxu0  ;;  %v1202_v1 = vpop.f32.mrf.mxu1 }
 0x223   :  { %v1203_v2 = vadd.f32 %v1202_v1, %v999_v0 }
 0x224   :  { %v1001_v3 = vpop.f32.mrf.mxu0  ;;  %v1204_v4 = vpop.f32.mrf.mxu1 }
 0x225   :  { %1211 = vst [vmem:[#allocation13] sm:$0xff] %v1203_v2  ;;  %v1205_v5 = vadd.f32 %v1204_v4, %v1001_v3 }
 0x226   :  { %v1003_v6 = vpop.f32.mrf.mxu0  ;;  %v1206_v7 = vpop.f32.mrf.mxu1 }
 0x227   :  { %1212 = vst [vmem:[#allocation13 + $0x8] sm:$0xff] %v1205_v5  ;;  %v1207_v8 = vadd.f32 %v1206_v7, %v1003_v6 }
 0x228   :  { %v1005_v9 = vpop.f32.mrf.mxu0  ;;  %v1208_v10 = vpop.f32.mrf.mxu1 }
 0x229   :  { %1213 = vst [vmem:[#allocation13 + $0x10] sm:$0xff] %v1207_v8  ;;  %v1209_v11 = vadd.f32 %v1208_v10, %v1005_v9 }
 0x22b   :  { %1214 = vst [vmem:[#allocation13 + $0x18] sm:$0xff] %v1209_v11 }
 0x22c   :  { %1710 = shalt.err (!%p1707_p6)
}
 0x22d   :  { %1226 = dma.vmem_to_hbm [thread:$0]  %s1221_s5, 512, %s1824_s6, [#allocation4], %s1730_s24, %s1730_s24, %s1731_s25  }
 0x22e   :  { %1727 = dma.done.wait [#allocation4], 512  }
 0x22f   :  { %1728 = vsyncadd [#allocation4], 4294966784 }
 0x230   :  { %1230 = vsyncpa [#allocation3], 1 }
 0x231   :  { %1231 = vsyncpa [#allocation6], 1 }
 0x232   :  { %1232 = vsyncpa [#allocation9], 1 }
 0x233   :  { %1233 = vsyncpa [#allocation12], 1 }
 0x234   :  { %1234 = vsyncpa [#allocation4], 1 }

</bundles_post_ra>
